<compile_context>
chip_gen: v6e
topology: v6e:2x2x1
jax: 0.10.0
libtpu: 0.0.40
codegen_flags: <defaults>
</compile_context>

<pallas_src>
import functools

import jax
import jax.numpy as jnp
from jax.experimental import pallas as pl
from jax.experimental.pallas import tpu as pltpu

_LANE = 128  # lane width of the reshaped (N, C, R, 128) view


def _entropy_partial_kernel(x_ref, out_ref, *, th, rows):
    """Per-block entropy partial sum.

    x_ref  : (1, C, TH, 128) tile — C is a non-minor axis, (TH, 128) are the
             dense sublane/lane axes.
    out_ref: (1, 1, 8, 128) f32 tile; the block's partial sum is written at
             [0, 0, 0, 0] (rest of the tile is zero).
    """
    x = x_ref[...].astype(jnp.float32)                   # (1, C, TH, 128)

    # Numerically-stable, folded entropy along the channel (non-minor) axis:
    # plain cross-vreg max/add, results are fully dense (1, 1, TH, 128).
    m = jnp.max(x, axis=1, keepdims=True)                # (1, 1, TH, 128)
    z = x - m
    e = jnp.exp(z)
    s = jnp.sum(e, axis=1, keepdims=True)                # (1, 1, TH, 128)
    sez = jnp.sum(e * z, axis=1, keepdims=True)          # (1, 1, TH, 128)
    h = jnp.log(s) - sez * pl.reciprocal(s)              # per-column entropy

    # One-hot (8,128) tile holding the scalar partial at (0,0): single
    # full-tile vector store, one vreg of setup work per block.
    sub = jax.lax.broadcasted_iota(jnp.int32, (1, 1, 8, 128), 2)
    lane = jax.lax.broadcasted_iota(jnp.int32, (1, 1, 8, 128), 3)
    onehot = (sub == 0) & (lane == 0)

    def _write(hv):
        out_ref[...] = jnp.where(onehot, jnp.sum(hv), 0.0)

    if rows % th == 0:
        # No ragged row block anywhere — no mask at all.
        _write(h)
    else:
        i = pl.program_id(1)
        last = pl.num_programs(1) - 1

        @pl.when(i != last)
        def _():
            _write(h)

        @pl.when(i == last)
        def _():
            # Only the last row block contains out-of-bounds rows (garbage,
            # possibly NaN/inf); select AFTER computing h is NaN-safe.
            row = i * th + jax.lax.broadcasted_iota(jnp.int32, h.shape, 2)
            _write(jnp.where(row < rows, h, 0.0))


def entropy_minimization_loss(x, reduction="mean"):
    """x: NCHW array (any float dtype). Returns scalar loss matching PyTorch."""
    if reduction not in ("mean", "sum"):
        # TODO(synk): reduction='none' returns the full NCHW entropy tensor;
        # this wrapper only exposes the scalar reductions (the common case).
        raise NotImplementedError("only 'mean' and 'sum' reductions implemented")

    n, c, h, w = x.shape
    l = h * w
    r = l // _LANE                       # dense 128-wide columns
    tail_cols = l - r * _LANE            # ragged remainder (< 128 columns)

    total = jnp.zeros((), jnp.float32)

    if r > 0:
        # (N, C, H, W) -> (N, C, R, 128): channel axis stays 3rd-minor.
        xb = x.reshape(n, c, l)
        if tail_cols:
            xb = xb[:, :, : r * _LANE]
        xb = xb.reshape(n, c, r, _LANE)

        # --- row-tile chooser ------------------------------------------------
        # Budget ~6 MiB of f32 working tile (c * th * 128 * 4B).  No sublane
        # padding factor: TH is the second-minor axis and is kept a multiple
        # of 8 (or the full row extent).  Double-buffered input plus fused
        # temporaries stay well inside the 48 MiB VMEM limit everywhere.
        tile_budget_bytes = 6 * 1024 * 1024
        th = max(8, (tile_budget_bytes // (c * _LANE * 4)) // 8 * 8)
        # v7x megacore: keep >= 2 grid programs when the batch axis alone can't.
        if n == 1 and r >= 16:
            th = min(th, max(8, (r // 2) // 8 * 8))
        if th >= r:
            th = r                        # full (possibly < 8) row extent is legal
        rb = pl.cdiv(r, th)

        kernel = functools.partial(_entropy_partial_kernel, th=th, rows=r)

        partials = pl.pallas_call(
            kernel,
            out_shape=jax.ShapeDtypeStruct((n, rb, 8, 128), jnp.float32),
            grid_spec=pltpu.PrefetchScalarGridSpec(
                num_scalar_prefetch=0,
                grid=(n, rb),
                in_specs=[
                    pl.BlockSpec((1, c, th, _LANE), lambda b, i: (b, 0, i, 0))
                ],
                out_specs=pl.BlockSpec((1, 1, 8, 128), lambda b, i: (b, i, 0, 0)),
            ),
            compiler_params=pltpu.CompilerParams(
                # Every program owns its own output block -> fully parallel
                # grid; v7x megacore shards it, v5e/v6e just loop.
                dimension_semantics=("parallel", "parallel"),
                vmem_limit_bytes=48 * 1024 * 1024,
            ),
        )(xb)
        total = total + jnp.sum(partials)

    if tail_cols:
        # Ragged lane tail (< 128 columns per (n, c)): tiny, so sum it in
        # plain JAX rather than padding the whole tensor in HBM.  Columns are
        # independent under softmax(dim=1), so the split is exact.
        xt = x.reshape(n, c, l)[:, :, r * _LANE:].astype(jnp.float32)
        pt = jax.nn.softmax(xt, axis=1)
        total = total + jnp.sum(-pt * jax.nn.log_softmax(xt, axis=1))

    if reduction == "mean":
        return total / jnp.float32(n * c * h * w)
    return total


if __name__ == "__main__":
    key = jax.random.PRNGKey(0)
    x = jax.random.normal(key, (2, 4, 16, 16), dtype=jnp.float32)  # NCHW

    loss = entropy_minimization_loss(x, reduction="mean")
    loss = jax.block_until_ready(loss)

    # pure-JAX reference check
    p = jax.nn.softmax(x, axis=1)
    lp = jax.nn.log_softmax(x, axis=1)
    ref = jnp.mean(-p * lp)
    assert jnp.allclose(loss, ref, rtol=1e-5, atol=1e-6), (loss, ref)

    # also exercise the 'sum' reduction path
    loss_sum = jax.block_until_ready(entropy_minimization_loss(x, reduction="sum"))
    ref_sum = jnp.sum(-p * lp)
    assert jnp.allclose(loss_sum, ref_sum, rtol=1e-5, atol=1e-4), (loss_sum, ref_sum)

    print("KERNEL_OK")
</pallas_src>

<mosaic_0001>
module attributes {stable_mosaic.version = 11 : i64} {
  func.func @_entropy_partial_kernel(%arg0: i32, %arg1: i32, %arg2: memref<1x4x2x128xf32, #tpu.memory_space<vmem>>, %arg3: memref<1x1x8x128xf32, #tpu.memory_space<vmem>>) attributes {dimension_semantics = [#tpu.dimension_semantics<parallel>, #tpu.dimension_semantics<parallel>], iteration_bounds = array<i64: 2, 1>, scalar_prefetch = 0 : i64, scratch_operands = 0 : i64, tpu.core_type = #tpu.core_type<tc>, window_params = [{transform_indices = @transform_0, window_bounds = array<i64: 1, 4, 2, 128>}, {transform_indices = @transform_1, window_bounds = array<i64: 1, 1, 8, 128>}]} {
    %c0 = arith.constant 0 : index
    %c0_0 = arith.constant 0 : index
    %c0_1 = arith.constant 0 : index
    %c0_2 = arith.constant 0 : index
    %0 = vector.load %arg2[%c0, %c0_0, %c0_1, %c0_2] : memref<1x4x2x128xf32, #tpu.memory_space<vmem>>, vector<1x4x2x128xf32>
    %cst = arith.constant dense<0xFF800000> : vector<1x2x128xf32>
    %1 = vector.multi_reduction <maximumf>, %0, %cst [1] : vector<1x4x2x128xf32> to vector<1x2x128xf32>
    %2 = vector.shape_cast %1 : vector<1x2x128xf32> to vector<1x1x2x128xf32>
    %3 = vector.broadcast %2 : vector<1x1x2x128xf32> to vector<1x4x2x128xf32>
    %4 = arith.subf %0, %3 : vector<1x4x2x128xf32>
    %5 = math.exp %4 : vector<1x4x2x128xf32>
    %cst_3 = arith.constant dense<0.000000e+00> : vector<1x2x128xf32>
    %6 = vector.multi_reduction <add>, %5, %cst_3 [1] : vector<1x4x2x128xf32> to vector<1x2x128xf32>
    %7 = vector.shape_cast %6 : vector<1x2x128xf32> to vector<1x1x2x128xf32>
    %8 = arith.mulf %5, %4 : vector<1x4x2x128xf32>
    %cst_4 = arith.constant dense<0.000000e+00> : vector<1x2x128xf32>
    %9 = vector.multi_reduction <add>, %8, %cst_4 [1] : vector<1x4x2x128xf32> to vector<1x2x128xf32>
    %10 = vector.shape_cast %9 : vector<1x2x128xf32> to vector<1x1x2x128xf32>
    %11 = math.log %7 : vector<1x1x2x128xf32>
    %12 = tpu.reciprocal %7 : vector<1x1x2x128xf32> -> vector<1x1x2x128xf32>
    %13 = arith.mulf %10, %12 : vector<1x1x2x128xf32>
    %14 = arith.subf %11, %13 : vector<1x1x2x128xf32>
    %15 = tpu.iota {dimensions = array<i32: 2>} : vector<1x1x8x128xi32>
    %16 = tpu.iota {dimensions = array<i32: 3>} : vector<1x1x8x128xi32>
    %c0_i32 = arith.constant 0 : i32
    %17 = vector.broadcast %c0_i32 : i32 to vector<1x1x8x128xi32>
    %18 = arith.cmpi eq, %15, %17 : vector<1x1x8x128xi32>
    %c0_i32_5 = arith.constant 0 : i32
    %19 = vector.broadcast %c0_i32_5 : i32 to vector<1x1x8x128xi32>
    %20 = arith.cmpi eq, %16, %19 : vector<1x1x8x128xi32>
    %21 = arith.andi %18, %20 : vector<1x1x8x128xi1>
    %22 = vector.shape_cast %14 : vector<1x1x2x128xf32> to vector<1x1x1x2x128xf32>
    %cst_6 = arith.constant dense<0.000000e+00> : vector<1xf32>
    %23 = vector.multi_reduction <add>, %22, %cst_6 [1, 2, 3, 4] : vector<1x1x1x2x128xf32> to vector<1xf32>
    %24 = vector.shape_cast %23 : vector<1xf32> to vector<1x1x1x1x1xf32>
    %25 = vector.extract %24[0, 0, 0, 0, 0] : f32 from vector<1x1x1x1x1xf32>
    %cst_7 = arith.constant 0.000000e+00 : f32
    %26 = vector.broadcast %25 : f32 to vector<1x1x8x128xf32>
    %27 = vector.broadcast %cst_7 : f32 to vector<1x1x8x128xf32>
    %28 = arith.select %21, %26, %27 : vector<1x1x8x128xi1>, vector<1x1x8x128xf32>
    %c0_8 = arith.constant 0 : index
    %c0_9 = arith.constant 0 : index
    %c0_10 = arith.constant 0 : index
    %c0_11 = arith.constant 0 : index
    %29 = vector.load %arg3[%c0_8, %c0_9, %c0_10, %c0_11] : memref<1x1x8x128xf32, #tpu.memory_space<vmem>>, vector<1x1x8x128xf32>
    tpu.vector_store %arg3[%c0_8, %c0_9, %c0_10, %c0_11], %28 {strides = array<i32>} : memref<1x1x8x128xf32, #tpu.memory_space<vmem>>, vector<1x1x8x128xf32>,
    return
  }
  func.func @transform_0(%arg0: i32, %arg1: i32) -> (i32, i32, i32, i32) {
    %c0_i32 = arith.constant 0 : i32
    %c0_i32_0 = arith.constant 0 : i32
    %c0_i32_1 = arith.constant 0 : i32
    return %arg0, %c0_i32, %arg1, %c0_i32_0 : i32, i32, i32, i32
  }
  func.func @transform_1(%arg0: i32, %arg1: i32) -> (i32, i32, i32, i32) {
    %c0_i32 = arith.constant 0 : i32
    %c0_i32_0 = arith.constant 0 : i32
    %c0_i32_1 = arith.constant 0 : i32
    return %arg0, %arg1, %c0_i32, %c0_i32_0 : i32, i32, i32, i32
  }
}

</mosaic_0001>

<bundles_post_ra>
// kernel: tpu_custom_call.1
= control target key start
LH: loop header
LB: loop body
LE: loop exit
PB: predicated region body
PF: predicated region fallthrough
CT: control target
= control target key end

     0   :  { %6 = vsyncpa [#allocation3], 0  ;;  %s687_s0 = inlined_call_operand.hbm [shape: f32[2,4,2,128], index: 0, kind: input, shape index: {}]   ;;  %s688_s1 = inlined_call_operand.hbm [shape: f32[2,1,8,128], index: 1, kind: output, shape index: {}]  }
   0x1   :  { %8 = vsyncpa [#allocation3 + $0x1], 0 }
   0x2   :  { %9 = vsyncpa [#allocation4], 0 }
   0x3   :  { %11 = vsyncpa [#allocation4 + $0x1], 0  ;;  %s532_s6 = smov 0   ;;  %s534_s7 = smov 0  }
   0x4   :  { %s536_s8 = smov 0   ;;  %s538_s9 = smov 0  }
   0x5   :  { %s540_s10 = smov 0   ;;  %s542_s11 = smov 0  }
   0x6 LB: > { %s315_s12 = sadd.s32 4294967295, %s516_s11   ;;  %s316_s13 = sadd.s32 4294967294, %s516_s11   ;;  %s516_s11 = sphi %s542_s11, %s17_s11   ;;  %s512_s10 = sphi %s540_s10, %s699_s10   ;;  %s508_s9 = sphi %s538_s9, %s698_s9   ;;  %s504_s8 = sphi %s536_s8, %s697_s8   ;;  %s500_s7 = sphi %s534_s7, %s696_s7   ;;  %s496_s6 = sphi %s532_s6, %s695_s6  }
   0x7   : > { %s29_s14 = sadd.s32 1, %s512_s10  ;;  %s38_s15 = sadd.s32 1, %s504_s8 }
   0x8   : > { %p31_p0 = scmp.ge.s32.totalorder %s29_s14, 2  ;;  %p45_p1 = scmp.ne.s32.totalorder %s504_s8, %s500_s7 }
   0x9   : > { %p46_p2 = scmp.eq.s32.totalorder %s516_s11, 0  ;;  %p51_p3 = scmp.ne.s32.totalorder %s500_s7, %s496_s6 }
   0xa   : > { %s701_s14 = smov (%p31_p0, %s29_s14), 0  ;;  %p52_p5 = scmp.eq.s32.totalorder %s315_s12, 0 }
   0xb   : > { %p573_p4 = por %p46_p2, %p45_p1  ;;  %s33_s17 = ssub.s32 %s512_s10, %s701_s14 }
   0xc   : > { %p77_p6 = scmp.eq.s32.totalorder %s315_s12, 1  ;;  %p36_p7 = scmp.eq.s32.totalorder %s33_s17, 0 }
   0xd   : > { %p579_p8 = por %p52_p5, %p51_p3  ;;  %p83_p10 = scmp.eq.s32.totalorder %s316_s13, 1 }
   0xe   : > { %p583_p9 = por %p77_p6, %p45_p1  ;;  %p344_p13 = scmp.lt.s32.totalorder %s516_s11, 2 }
   0xf   : > { %s588_s20 = scalar_select %p36_p7, %s504_s8, %s38_s15  }
  0x10   : > { %p590_p11 = por %p83_p10, %p51_p3  ;;  %s103_s22 = sand.u32 1, %s504_s8  }
  0x11   : > { %s319_s23 = sshll.u32 %s103_s22, 3  ;;  %s329_s24 = sshll.u32 %s512_s10, 7 }
  0x12   : > { %s114_s27 = scalar_lea.hbm %s687_s0, %s329_s24  ;;  %s107_s28 = scalar_lea.vmem [#allocation2], %s319_s23 }
  0x13   : > { %s115_s29 = sshll.u32 %s107_s28, 4  ;;  %p603_p0 = pnand %p344_p13, %p573_p4  ;;  %s116_s29 = int_to_ptr.vmem [resolvable:$true] %s115_s29 }
  0x14   : > { %p322_p1 = scmp.ge.s32.totalorder %s516_s11, 1  ;;  %s104_s2 = scalar_lea.sflag [#allocation3], %s103_s22 }
  0x15   : > { %p410_p2 = pneg %p603_p0  ;;  %s421_s3 = scalar_lea.vmem %s116_s29, 128 }
  0x16   : > { %p422_p3 = scmp.ne.s32.totalorder %s116_s29, %s421_s3  ;;  %s518_s4 = smov [#allocation2]  }
  0x17   : > { %s426_s5 = sshll.u32 %s518_s4, 4  ;;  %s427_s5 = int_to_ptr.vmem [resolvable:$false] %s426_s5 }
  0x18   : > { %p424_p5 = pnand %p422_p3, %p410_p2  ;;  %s428_s12 = scalar_lea.vmem %s427_s5, 256 }
  0x19   : > { %p429_p7 = scmp.lt.s32.totalorder %s116_s29, %s427_s5  ;;  %p430_p10 = scmp.lt.s32.totalorder %s428_s12, %s421_s3 }
  0x1a   : > { %p425_p6 = pneg %p424_p5 }
  0x1b   : > { %p431_p12 = por %p430_p10, %p429_p7 }
  0x1d   : > { %p432_p4 = pnand %p431_p12, %p425_p6 }
  0x1f   : > { %435 = shalt.err (!%p432_p4)
}
  0x20   : > { %s519_s13 = smov 32   ;;  %s520_s15 = smov 2  }
  0x21   : > { %339 = dma.hbm_to_vmem [thread:$0]  (!%p603_p0), %s114_s27, 128, %s116_s29, %s104_s2, %s519_s13, %s519_s13, %s520_s15  }
  0x22   : > { %p123_p13 = scmp.lt.s32.totalorder %s516_s11, 3 }
  0x24   : > { %p124_p2 = pnand %p322_p1, %p123_p13 }
  0x25   : > { %s616_s16 = sand.u32 (!%p124_p2), 1, %s500_s7  }
  0x26   : > { %127 = sbr.rel (%p124_p2) target bundleno = 312 (0x138), region = 24  ;;  %s323_s17 = sshll.u32 (!%p124_p2), %s616_s16, 3 }
  0x27   : > { %s130_s22 = scalar_lea.sflag (!%p124_p2), [#allocation3], %s616_s16  ;;  %s133_s23 = scalar_lea.vmem (!%p124_p2), [#allocation2], %s323_s17 }
  0x2b   : > { %487 = dma.done.wait (%p579_p8), %s130_s22, 128  }
  0x2c   : > { %489 = vsyncadd (%p579_p8), %s130_s22, 4294967168  ;;  %vm156_vm0 = vcmask 1041408   ;;  %v152_v0 = vld [vmem:[%s133_s23] sm:$0x3]  ;;  %v153_v1 = vld [vmem:[%s133_s23 + $0x2] sm:$0x3]  ;;  %v199_v54 = vlaneseq }
  0x2d   : > { %v154_v2 = vld [vmem:[%s133_s23 + $0x4] sm:$0x3]  ;;  %v155_v3 = vld [vmem:[%s133_s23 + $0x6] sm:$0x3]  ;;  %v157_v4 = vsel %vm156_vm0, %v152_v0, -inf  ;;  %v158_v5 = vsel %vm156_vm0, %v153_v1, -inf }
  0x2e   : > { %v159_v6 = vsel %vm156_vm0, %v154_v2, -inf  ;;  %v160_v7 = vsel %vm156_vm0, %v155_v3, -inf  ;;  %v161_v8 = vmax.f32 %v157_v4, %v158_v5  ;;  %v200_v55 = vshrl.u32 %v199_v54, 7  ;;  %s326_s18 = sshll.u32 %s508_s9, 7  ;;  %s151_s24 = scalar_lea.vmem [#allocation5], %s323_s17 }
  0x2f   : > { %v162_v9 = vmax.f32 %v159_v6, %v160_v7  ;;  %v202_v56 = vand.u32 127, %v199_v54  ;;  %s234_s25 = sshll.u32 %s151_s24, 4  ;;  %s645_s29 = scalar_lea.hbm %s688_s1, %s326_s18  ;;  %s235_s25 = int_to_ptr.vmem [resolvable:$true] %s234_s25 }
  0x30   : > { %vm203_vm1 = vcmp.eq.s32.totalorder %v200_v55, 0  ;;  %s220_s30 = scalar_lea.sflag [#allocation4], %s616_s16  ;;  %s436_s2 = scalar_lea.vmem %s235_s25, 128 }
  0x31   : > { %v163_v10 = vmax.f32 %v161_v8, %v162_v9  ;;  %vm204_vm2 = vcmp.eq.s32.totalorder %v202_v56, 0  ;;  %p437_p8 = scmp.ne.s32.totalorder %s235_s25, %s436_s2  ;;  %s521_s9 = smov [#allocation5]  }
  0x32   : > { %vm205_vm3 = vmand %vm203_vm1, %vm204_vm2  ;;  %s440_s3 = sshll.u32 %s521_s9, 4  ;;  %s441_s3 = int_to_ptr.vmem [resolvable:$false] %s440_s3 }
  0x33   : > { %v164_v11 = vsub.f32 %v152_v0, %v163_v10  ;;  %v165_v12 = vsub.f32 %v153_v1, %v163_v10  ;;  %v166_v13 = vsub.f32 %v154_v2, %v163_v10  ;;  %v167_v14 = vsub.f32 %v155_v3, %v163_v10  ;;  %p438_p12 = pnand %p437_p8, %p583_p9  ;;  %s442_s4 = scalar_lea.vmem %s441_s3, 256 }
  0x34   : > { %p443_p1 = scmp.lt.s32.totalorder %s235_s25, %s441_s3  ;;  %p444_p3 = scmp.lt.s32.totalorder %s442_s4, %s436_s2 }
  0x35   : > { %v168_v15 = vmul.f32 1.442695, %v164_v11  ;;  %v170_v16 = vmul.f32 1.442695, %v165_v12  ;;  %v172_v17 = vmul.f32 1.442695, %v166_v13  ;;  %p439_p0 = pneg %p438_p12 }
  0x36   : > { %v174_v18 = vmul.f32 1.442695, %v167_v14  ;;  %p445_p5 = por %p444_p3, %p443_p1 }
  0x37   : > { %396 = vpow2.f32 %v168_v15 }
  0x38   : > { %398 = vpow2.f32 %v170_v16  ;;  %p446_p6 = pnand %p445_p5, %p439_p0 }
  0x39   : > { %400 = vpow2.f32 %v172_v17 }
  0x3a   : > { %402 = vpow2.f32 %v174_v18 }
  0x44   : > { %v397_v19 = vpop.eup %396 }
  0x45   : > { %v399_v20 = vpop.eup %398  ;;  %v176_v21 = vsel %vm156_vm0, %v397_v19, 0.0  ;;  %v183_v29 = vmul.f32 %v397_v19, %v164_v11 }
  0x46   : > { %v401_v22 = vpop.eup %400  ;;  %v177_v23 = vsel %vm156_vm0, %v399_v20, 0.0  ;;  %v184_v30 = vmul.f32 %v399_v20, %v165_v12 }
  0x47   : > { %v403_v24 = vpop.eup %402  ;;  %v178_v25 = vadd.f32 %v177_v23, %v176_v21  ;;  %v179_v26 = vsel %vm156_vm0, %v401_v22, 0.0  ;;  %v185_v32 = vmul.f32 %v401_v22, %v166_v13  ;;  %v187_v33 = vsel %vm156_vm0, %v183_v29, 0.0 }
  0x48   : > { %v181_v27 = vsel %vm156_vm0, %v403_v24, 0.0  ;;  %v188_v34 = vsel %vm156_vm0, %v184_v30, 0.0  ;;  %v186_v36 = vmul.f32 %v403_v24, %v167_v14 }
  0x49   : > { %v180_v28 = vadd.f32 %v179_v26, %v178_v25  ;;  %v189_v35 = vadd.f32 %v188_v34, %v187_v33  ;;  %v190_v37 = vsel %vm156_vm0, %v185_v32, 0.0 }
  0x4a   : > { %v192_v39 = vsel %vm156_vm0, %v186_v36, 0.0 }
  0x4b   : > { %v182_v31 = vadd.f32 %v181_v27, %v180_v28  ;;  %v191_v38 = vadd.f32 %v190_v37, %v189_v35 }
  0x4d   : > { %404 = vlog2.f32 %v182_v31  ;;  %v193_v40 = vadd.f32 %v192_v39, %v191_v38 }
  0x4e   : > { %406 = vrcp.f32 %v182_v31 }
  0x5a   : > { %v405_v41 = vpop.eup %404 }
  0x5b   : > { %v407_v42 = vpop.eup %406  ;;  %v195_v43 = vmul.f32 0.6931472, %v405_v41 }
  0x5c   : > { %v197_v44 = vmul.f32 %v407_v42, %v193_v40 }
  0x5e   : > { %v198_v45 = vsub.f32 %v195_v43, %v197_v44 }
  0x60   : > { %v206_v46 = vsel %vm156_vm0, %v198_v45, 0.0 }
  0x61   : > { %207 = vadd.xlane.f32.xlu0 %v206_v46 }
  0xea   : > { %v208_v47 = vpop.xlane.xlu0 %207 }
  0xeb   : > { %v209_v48 = vrot.slane %v208_v47, 4 }
  0xed   : > { %v210_v49 = vadd.f32 %v209_v48, %v208_v47 }
  0xef   : > { %v211_v50 = vrot.slane %v210_v49, 2 }
  0xf1   : > { %v212_v51 = vadd.f32 %v211_v50, %v210_v49 }
  0xf3   : > { %v213_v52 = vrot.slane %v212_v51, 1 }
  0xf5   : > { %v214_v53 = vadd.f32 %v213_v52, %v212_v51 }
  0xf7   : > { %330 = vpush %v214_v53 }
 0x128   : > { %s331_s26 = spop %330 }
 0x129   : > { %v216_v57 = vstv %s331_s26 }
 0x12a   : > { %v217_v58 = vsel %vm205_vm3, %v216_v57, 0.0 }
 0x12b   : > { %218 = vst [vmem:[%s151_s24] sm:$0xff] %v217_v58 }
 0x12c   : > { %449 = shalt.err (!%p446_p6)
}
 0x12d   : > { %s450_s5 = scalar_lea.hbm %s645_s29, 128  ;;  %s454_s15 = scalar_lea.hbm %s688_s1, 256 }
 0x12e   : > { %p451_p7 = scmp.ne.s32.totalorder %s645_s29, %s450_s5  ;;  %p455_p13 = scmp.lt.s32.totalorder %s645_s29, %s688_s1 }
 0x12f   : > { %p456_p2 = scmp.lt.s32.totalorder %s454_s15, %s450_s5 }
 0x130   : > { %p452_p10 = pnand %p451_p7, %p583_p9 }
 0x131   : > { %p457_p8 = por %p456_p2, %p455_p13 }
 0x132   : > { %p453_p4 = pneg %p452_p10 }
 0x134   : > { %p458_p12 = pnand %p457_p8, %p453_p4 }
 0x136   : > { %461 = shalt.err (!%p458_p12)
}
 0x137   : > { %334 = dma.vmem_to_hbm [thread:$0]  (%p583_p9), %s235_s25, 128, %s645_s29, %s220_s30  }
 0x138 PF: > { %s246_s22 = sand.u32 1, %s496_s6   ;;  %p694_p0 = scmp.ge.s32.totalorder %s516_s11, 2 }
 0x139   : > { %s247_s23 = scalar_lea.sflag [#allocation4], %s246_s22 }
 0x13a   : > { %p341_p1 = pnand %p694_p0, %p590_p11 }
 0x13c   : > { %p342_p3 = pneg %p341_p1 }
 0x13e   : > { %491 = dma.done.wait (%p342_p3), %s247_s23, 128  }
 0x13f   : > { %493 = vsyncadd (%p342_p3), %s247_s23, 4294967168  ;;  %s17_s11 = sadd.s32 1, %s516_s11   ;;  %s695_s6 = smov %s500_s7 }
 0x140   : > { %p14_p5 = scmp.ge.s32.totalorder %s17_s11, 4   ;;  %s696_s7 = smov %s504_s8 }
 0x141   : > { %s697_s8 = smov %s588_s20  ;;  %s698_s9 = smov %s512_s10 }
 0x142   : > { %s699_s10 = smov %s701_s14  ;;  %16 = sbr.rel (!%p14_p5) target bundleno = 6 (0x6), region = 69 }
 0x147   :  { %252 = vsyncpa [#allocation3], 1 }
 0x148   :  { %254 = vsyncpa [#allocation3 + $0x1], 1 }
 0x149   :  { %255 = vsyncpa [#allocation4], 1 }
 0x14a   :  { %257 = vsyncpa [#allocation4 + $0x1], 1 }

</bundles_post_ra>
